<compile_context>
chip_gen: v7x
topology: tpu7x:2x2x1
jax: 0.10.0
libtpu: 0.0.40
codegen_flags: <defaults>
</compile_context>

<pallas_src>
import functools

import jax
import jax.numpy as jnp
from jax import lax
from jax.experimental import pallas as pl
from jax.experimental.pallas import tpu as pltpu


def _sepconv_fused_kernel(x_ref, wf_ref, bf_ref, out_ref, *, KH, KW, W, L):
    # x_ref  : (1, Cin, H*W)        VMEM  (flat image, spatial axis on lanes)
    # wf_ref : (Cout, KH*KW*Cin)    VMEM  (fused depthwise+pointwise weight)
    # bf_ref : (Cout, 1)            VMEM  (fused bias, f32)
    # out_ref: (1, Cout, Ho*W)      VMEM  (flat output rows of width W; the last
    #                                      KW-1 columns of each row are conv
    #                                      "overhang" and are cropped outside)
    x = x_ref[0]                                       # (Cin, H*W)

    # im2col patch matrix: one statically lane-shifted view of the flat image
    # per tap (shift work lands on the XLU slot, not the VPU).
    taps = []
    for ky in range(KH):                               # static 3x3 unroll
        for kx in range(KW):
            off = ky * W + kx                          # static lane offset
            taps.append(x[:, off:off + L])             # (Cin, L)
    patches = jnp.concatenate(taps, axis=0)            # (KH*KW*Cin, L)

    # Single MXU matmul: (Cout, K) @ (K, L) -> (Cout, L), f32 accumulation.
    y = jnp.dot(wf_ref[...], patches, preferred_element_type=jnp.float32)
    y = y + bf_ref[...].astype(jnp.float32)            # (Cout, 1) lane broadcast

    # Only the first L = (Ho-1)*W + Wo flat positions are meaningful; the last
    # KW-1 positions of the block are never used by the caller (cropped).
    out_ref[0, :, :L] = y.astype(out_ref.dtype)


def separable_conv2d(x_nchw, dw_weight, dw_bias, pw_weight, pw_bias):
    """Forward pass matching the PyTorch SeparableConvolutionLayer.

    x_nchw   : (N, Cin, H, W)
    dw_weight: (Cin, 1, KH, KW)   (torch depthwise Conv2d weight, groups=Cin)
    dw_bias  : (Cin,)
    pw_weight: (Cout, Cin, 1, 1)  (torch 1x1 Conv2d weight)
    pw_bias  : (Cout,)
    returns  : (N, Cout, H-KH+1, W-KW+1)
    """
    N, Cin, H, W = x_nchw.shape
    Cout = pw_weight.shape[0]
    KH, KW = dw_weight.shape[2], dw_weight.shape[3]
    Ho, Wo = H - KH + 1, W - KW + 1
    HW = H * W
    L = (Ho - 1) * W + Wo                 # flat output positions actually needed
    K = KH * KW * Cin

    # ---- trace-time weight/bias fusion (tiny, done once by XLA) ----
    pw2 = pw_weight[:, :, 0, 0].astype(jnp.float32)                   # (Cout, Cin)
    dw3 = dw_weight[:, 0, :, :].astype(jnp.float32)                   # (Cin, KH, KW)
    wf = pw2[:, None, None, :] * jnp.transpose(dw3, (1, 2, 0))[None]  # (Cout,KH,KW,Cin)
    wf = wf.reshape(Cout, K).astype(x_nchw.dtype)                     # (Cout, K)
    bf = (pw2 @ dw_bias.astype(jnp.float32)
          + pw_bias.astype(jnp.float32)).reshape(Cout, 1)             # (Cout, 1) f32

    # Free (metadata-only) reshape: flat spatial axis goes to lanes.
    x_flat = x_nchw.reshape(N, Cin, HW)

    kernel = functools.partial(_sepconv_fused_kernel, KH=KH, KW=KW, W=W, L=L)

    itemsize = x_nchw.dtype.itemsize
    bytes_accessed = (N * Cin * HW * itemsize            # input
                      + N * Cout * Ho * W * itemsize     # output
                      + Cout * K * itemsize + Cout * 4)  # fused weights + bias

    out_flat = pl.pallas_call(
        kernel,
        out_shape=jax.ShapeDtypeStruct((N, Cout, Ho * W), x_nchw.dtype),
        grid_spec=pltpu.PrefetchScalarGridSpec(
            num_scalar_prefetch=0,
            grid=(N,),
            in_specs=[
                pl.BlockSpec((1, Cin, HW), lambda n: (n, 0, 0)),
                pl.BlockSpec((Cout, K), lambda n: (0, 0)),
                pl.BlockSpec((Cout, 1), lambda n: (0, 0)),
            ],
            out_specs=pl.BlockSpec((1, Cout, Ho * W), lambda n: (n, 0, 0)),
        ),
        compiler_params=pltpu.CompilerParams(
            dimension_semantics=("parallel",)),
        cost_estimate=pl.CostEstimate(
            flops=2 * N * Cout * K * L,
            transcendentals=0,
            bytes_accessed=bytes_accessed),
    )(x_flat, wf, bf)

    # Rows are W wide; drop the KW-1 overhang columns.  reshape is free
    # (row-major), the crop is a tiny slice of the output only.
    return out_flat.reshape(N, Cout, Ho, W)[:, :, :, :Wo]


def _reference(x_nchw, dw_weight, dw_bias, pw_weight, pw_bias):
    """Pure-JAX reference using lax.conv (same semantics as torch Conv2d)."""
    Cin = x_nchw.shape[1]
    y = lax.conv_general_dilated(
        x_nchw, dw_weight, window_strides=(1, 1), padding="VALID",
        dimension_numbers=("NCHW", "OIHW", "NCHW"),
        feature_group_count=Cin) + dw_bias[None, :, None, None]
    y = lax.conv_general_dilated(
        y, pw_weight, window_strides=(1, 1), padding="VALID",
        dimension_numbers=("NCHW", "OIHW", "NCHW")) + pw_bias[None, :, None, None]
    return y


if __name__ == "__main__":
    # Small deterministic config: batch=2, nin=4, nout=8, spatial=16, kernel=3
    N, Cin, H, W = 2, 4, 16, 16
    Cout, Kk = 8, 3

    key = jax.random.PRNGKey(0)
    kx, kdw, kdb, kpw, kpb = jax.random.split(key, 5)

    x = jax.random.normal(kx, (N, Cin, H, W), dtype=jnp.float32)
    dw_weight = jax.random.normal(kdw, (Cin, 1, Kk, Kk), dtype=jnp.float32) * 0.1
    dw_bias = jax.random.normal(kdb, (Cin,), dtype=jnp.float32) * 0.1
    pw_weight = jax.random.normal(kpw, (Cout, Cin, 1, 1), dtype=jnp.float32) * 0.1
    pw_bias = jax.random.normal(kpb, (Cout,), dtype=jnp.float32) * 0.1

    out = separable_conv2d(x, dw_weight, dw_bias, pw_weight, pw_bias)
    out = jax.block_until_ready(out)

    ref = _reference(x, dw_weight, dw_bias, pw_weight, pw_bias)
    assert out.shape == (N, Cout, H - Kk + 1, W - Kk + 1), out.shape
    assert jnp.allclose(out, ref, atol=1e-4, rtol=1e-4), "mismatch vs reference"

    print("KERNEL_OK")
</pallas_src>

<mosaic_0001>
module attributes {stable_mosaic.version = 11 : i64} {
  func.func @_sepconv_fused_kernel(%arg0: i32, %arg1: memref<1x4x256xf32, #tpu.memory_space<vmem>>, %arg2: memref<8x36xf32, #tpu.memory_space<vmem>>, %arg3: memref<8x1xf32, #tpu.memory_space<vmem>>, %arg4: memref<1x8x224xf32, #tpu.memory_space<vmem>>) attributes {dimension_semantics = [#tpu.dimension_semantics<parallel>], iteration_bounds = array<i64: 2>, scalar_prefetch = 0 : i64, scratch_operands = 0 : i64, tpu.core_type = #tpu.core_type<tc>, window_params = [{transform_indices = @transform_0, window_bounds = array<i64: 1, 4, 256>}, {pipeline_mode = #tpu.pipeline_mode<synchronous>, transform_indices = @transform_1, window_bounds = array<i64: 8, 36>}, {pipeline_mode = #tpu.pipeline_mode<synchronous>, transform_indices = @transform_2, window_bounds = array<i64: 8, 1>}, {transform_indices = @transform_3, window_bounds = array<i64: 1, 8, 224>}]} {
    %c0 = arith.constant 0 : index
    %c0_0 = arith.constant 0 : index
    %c0_1 = arith.constant 0 : index
    %0 = vector.load %arg1[%c0, %c0_0, %c0_1] : memref<1x4x256xf32, #tpu.memory_space<vmem>>, vector<1x4x256xf32>
    %1 = vector.shape_cast %0 : vector<1x4x256xf32> to vector<4x256xf32>
    %2 = vector.extract_strided_slice %1 {offsets = [0, 0], sizes = [4, 222], strides = [1, 1]} : vector<4x256xf32> to vector<4x222xf32>
    %3 = vector.extract_strided_slice %1 {offsets = [0, 1], sizes = [4, 222], strides = [1, 1]} : vector<4x256xf32> to vector<4x222xf32>
    %4 = vector.extract_strided_slice %1 {offsets = [0, 2], sizes = [4, 222], strides = [1, 1]} : vector<4x256xf32> to vector<4x222xf32>
    %5 = vector.extract_strided_slice %1 {offsets = [0, 16], sizes = [4, 222], strides = [1, 1]} : vector<4x256xf32> to vector<4x222xf32>
    %6 = vector.extract_strided_slice %1 {offsets = [0, 17], sizes = [4, 222], strides = [1, 1]} : vector<4x256xf32> to vector<4x222xf32>
    %7 = vector.extract_strided_slice %1 {offsets = [0, 18], sizes = [4, 222], strides = [1, 1]} : vector<4x256xf32> to vector<4x222xf32>
    %8 = vector.extract_strided_slice %1 {offsets = [0, 32], sizes = [4, 222], strides = [1, 1]} : vector<4x256xf32> to vector<4x222xf32>
    %9 = vector.extract_strided_slice %1 {offsets = [0, 33], sizes = [4, 222], strides = [1, 1]} : vector<4x256xf32> to vector<4x222xf32>
    %10 = vector.extract_strided_slice %1 {offsets = [0, 34], sizes = [4, 222], strides = [1, 1]} : vector<4x256xf32> to vector<4x222xf32>
    %11 = tpu.concatenate %2, %3, %4, %5, %6, %7, %8, %9, %10 in 0 : vector<4x222xf32>, vector<4x222xf32>, vector<4x222xf32>, vector<4x222xf32>, vector<4x222xf32>, vector<4x222xf32>, vector<4x222xf32>, vector<4x222xf32>, vector<4x222xf32> -> vector<36x222xf32>
    %c0_2 = arith.constant 0 : index
    %c0_3 = arith.constant 0 : index
    %12 = vector.load %arg2[%c0_2, %c0_3] : memref<8x36xf32, #tpu.memory_space<vmem>>, vector<8x36xf32>
    %cst = arith.constant dense<0.000000e+00> : vector<8x222xf32>
    %13 = tpu.matmul %12, %11, %cst {dimension_numbers = #tpu.dot_dimension_numbers<[1], [0], [0], [1], [0, 0, 1, 1], [], []>} : vector<8x36xf32>, vector<36x222xf32>, vector<8x222xf32> -> vector<8x222xf32>
    %c0_4 = arith.constant 0 : index
    %c0_5 = arith.constant 0 : index
    %14 = vector.load %arg3[%c0_4, %c0_5] : memref<8x1xf32, #tpu.memory_space<vmem>>, vector<8x1xf32>
    %15 = vector.broadcast %14 : vector<8x1xf32> to vector<8x222xf32>
    %16 = arith.addf %13, %15 : vector<8x222xf32>
    %c0_6 = arith.constant 0 : index
    %c0_7 = arith.constant 0 : index
    %c0_8 = arith.constant 0 : index
    %17 = vector.load %arg4[%c0_6, %c0_7, %c0_8] : memref<1x8x224xf32, #tpu.memory_space<vmem>>, vector<1x8x222xf32>
    %18 = vector.shape_cast %17 : vector<1x8x222xf32> to vector<8x222xf32>
    %19 = vector.shape_cast %16 : vector<8x222xf32> to vector<1x8x222xf32>
    tpu.vector_store %arg4[%c0_6, %c0_7, %c0_8], %19 {strides = array<i32>} : memref<1x8x224xf32, #tpu.memory_space<vmem>>, vector<1x8x222xf32>,
    return
  }
  func.func @transform_0(%arg0: i32) -> (i32, i32, i32) {
    %c0_i32 = arith.constant 0 : i32
    %c0_i32_0 = arith.constant 0 : i32
    %c0_i32_1 = arith.constant 0 : i32
    return %arg0, %c0_i32, %c0_i32_0 : i32, i32, i32
  }
  func.func @transform_1(%arg0: i32) -> (i32, i32) {
    %c0_i32 = arith.constant 0 : i32
    %c0_i32_0 = arith.constant 0 : i32
    %c0_i32_1 = arith.constant 0 : i32
    return %c0_i32, %c0_i32_0 : i32, i32
  }
  func.func @transform_2(%arg0: i32) -> (i32, i32) {
    %c0_i32 = arith.constant 0 : i32
    %c0_i32_0 = arith.constant 0 : i32
    %c0_i32_1 = arith.constant 0 : i32
    return %c0_i32, %c0_i32_0 : i32, i32
  }
  func.func @transform_3(%arg0: i32) -> (i32, i32, i32) {
    %c0_i32 = arith.constant 0 : i32
    %c0_i32_0 = arith.constant 0 : i32
    %c0_i32_1 = arith.constant 0 : i32
    return %arg0, %c0_i32, %c0_i32_0 : i32, i32, i32
  }
}

</mosaic_0001>

<bundles_post_ra>
// kernel: tpu_custom_call.1
= control target key start
LH: loop header
LB: loop body
LE: loop exit
PB: predicated region body
PF: predicated region fallthrough
CT: control target
= control target key end

     0   :  { %8 = vsyncpa [#allocation3], 0  ;;  %s869_s0 = inlined_call_operand.hbm [shape: f32[2,4,256], index: 0, kind: input, shape index: {}]   ;;  %s870_s1 = inlined_call_operand.vmem [shape: f32[8,36], index: 1, kind: input, shape index: {}]   ;;  %s871_s2 = inlined_call_operand.vmem [shape: f32[8,1], index: 2, kind: input, shape index: {}]   ;;  %s872_s3 = inlined_call_operand.hbm [shape: f32[2,8,224], index: 3, kind: output, shape index: {}]  }
   0x1   :  { %10 = vsyncpa [#allocation3 + $0x1], 0 }
   0x2   :  { %11 = vsyncpa [#allocation4], 0 }
   0x3   :  { %13 = vsyncpa [#allocation4 + $0x1], 0  ;;  %s688_s12 = smov 0   ;;  %s690_s13 = smov 0  }
   0x4   :  { %s692_s14 = smov 0   ;;  %s694_s15 = smov 0  }
   0x5 LB: > { %s709_s16 = sadd.s32 4294967295, %s654_s15   ;;  %s436_s17 = sadd.s32 4294967294, %s654_s15   ;;  %s654_s15 = sphi %s694_s15, %s887_s15   ;;  %s650_s14 = sphi %s692_s14, %s886_s14   ;;  %s646_s13 = sphi %s690_s13, %s885_s13   ;;  %s642_s12 = sphi %s688_s12, %s884_s12  }
   0x6   : > { %s713_s18 = sadd.s32 1, %s654_s15   ;;  %s26_s19 = sadd.s32 1, %s650_s14 }
   0x7   : > { %s23_s20 = ssub.s32 %s654_s15, %s713_s18  ;;  %p33_p0 = scmp.ne.s32.totalorder %s650_s14, %s646_s13 }
   0x8   : > { %p24_p1 = scmp.eq.s32.totalorder %s23_s20, 0  ;;  %p34_p2 = scmp.eq.s32.totalorder %s654_s15, 0 }
   0x9   : > { %p39_p3 = scmp.ne.s32.totalorder %s646_s13, %s642_s12  ;;  %p40_p4 = scmp.eq.s32.totalorder %s709_s16, 0 }
   0xa   : > { %s725_s21 = scalar_select %p24_p1, %s650_s14, %s26_s19  }
   0xb   : > { %p727_p5 = por %p34_p2, %p33_p0  ;;  %p731_p6 = por %p40_p4, %p39_p3 }
   0xc   : > { %p105_p7 = scmp.eq.s32.totalorder %s709_s16, 1  ;;  %p111_p8 = scmp.eq.s32.totalorder %s436_s17, 1 }
   0xd   : > { %p475_p10 = scmp.lt.s32.totalorder %s654_s15, 2  ;;  %s137_s26 = sand.u32 1, %s650_s14  }
   0xe   : > { %p738_p11 = por %p105_p7, %p33_p0  ;;  %p742_p12 = por %p111_p8, %p39_p3 }
   0xf   : > { %s453_s27 = sshll.u32 %s654_s15, 7  ;;  %s439_s28 = sshll.u32 %s137_s26, 3 }
  0x10   : > { %s876_s24 = scalar_select %p738_p11, 1, 0 }
  0x11   : > { %s877_s25 = scalar_select %p742_p12, 1, 0 }
  0x12   : > { %s751_s4 = scalar_lea.hbm %s869_s0, %s453_s27  ;;  %s141_s5 = scalar_lea.vmem [#allocation2], %s439_s28 }
  0x13   : > { %s149_s6 = sshll.u32 %s141_s5, 4  ;;  %p755_p13 = pnand %p475_p10, %p727_p5  ;;  %s759_s6 = int_to_ptr.vmem [resolvable:$true] %s149_s6 }
  0x14   : > { %s138_s8 = scalar_lea.sflag [#allocation3], %s137_s26  ;;  %s558_s9 = scalar_lea.hbm %s751_s4, 128 }
  0x15   : > { %p559_p2 = scmp.ne.s32.totalorder %s751_s4, %s558_s9  ;;  %p560_p3 = pneg %p755_p13 }
  0x16   : > { %s563_s17 = scalar_lea.hbm %s869_s0, 256  ;;  %p564_p5 = scmp.lt.u32.totalorder %s751_s4, %s869_s0 }
  0x17   : > { %p561_p4 = pnand %p560_p3, %p559_p2  ;;  %p565_p8 = scmp.lt.u32.totalorder %s563_s17, %s558_s9 }
  0x18   : > { %p567_p9 = scmp.lt.u32.totalorder %s558_s9, %s751_s4 }
  0x19   : > { %p562_p7 = pneg %p561_p4  ;;  %p566_p10 = por %p565_p8, %p564_p5 }
  0x1b   : > { %p568_p0 = por %p567_p9, %p566_p10 }
  0x1d   : > { %p569_p1 = pnand %p568_p0, %p562_p7 }
  0x1f   : > { %572 = shalt.err (!%p569_p1)
}
  0x20   : > { %s573_s22 = scalar_lea.vmem %s759_s6, 128  ;;  %s656_s26 = smov [#allocation2]  }
  0x21   : > { %p574_p2 = scmp.ne.s32.totalorder %s759_s6, %s573_s22  ;;  %s578_s27 = sshll.u32 %s656_s26, 4  ;;  %s579_s27 = int_to_ptr.vmem [resolvable:$false] %s578_s27 }
  0x22   : > { %s580_s28 = scalar_lea.vmem %s579_s27, 256  ;;  %p581_p11 = scmp.lt.s32.totalorder %s759_s6, %s579_s27 }
  0x23   : > { %p576_p4 = pnand %p574_p2, %p560_p3  ;;  %p582_p5 = scmp.lt.s32.totalorder %s580_s28, %s573_s22 }
  0x25   : > { %p577_p12 = pneg %p576_p4  ;;  %p583_p8 = por %p582_p5, %p581_p11 }
  0x27   : > { %p584_p9 = pnand %p583_p8, %p577_p12 }
  0x29   : > { %587 = shalt.err (!%p584_p9)
}
  0x2a   : > { %470 = dma.hbm_to_vmem [thread:$0]  (!%p755_p13), %s751_s4, 128, %s759_s6, %s138_s8  }
  0x2b   : > { %p879_p0 = scmp.lt.s32.totalorder %s654_s15, 3  ;;  %p880_p1 = scmp.ge.s32.totalorder %s654_s15, 1 }
  0x2d   : > { %p155_p3 = pnand %p880_p1, %p879_p0 }
  0x2e   : > { %s793_s29 = sand.u32 (!%p155_p3), 1, %s646_s13  }
  0x2f   : > { %158 = sbr.rel (%p155_p3) target bundleno = 427 (0x1ab), region = 32  ;;  %s443_s30 = sshll.u32 (!%p155_p3), %s793_s29, 3 }
  0x30   : > { %s161_s5 = scalar_lea.sflag (!%p155_p3), [#allocation3], %s793_s29  ;;  %s164_s9 = scalar_lea.vmem (!%p155_p3), [#allocation2], %s443_s30 }
  0x36   : > { %633 = dma.done.wait (%p731_p6), %s161_s5, 128  }
  0x37   : > { %635 = vsyncadd (%p731_p6), %s161_s5, 4294967168  ;;  %v187_v0 = vld [vmem:[%s164_s9] sm:$0xff]  ;;  %s657_s4 = smov 127   ;;  %s658_s6 = smov 112   ;;  %v663_v5 = vmov 0.0   ;;  %v664_v6 = vmov 0  }
  0x38   : > { %v191_v1 = vcombine.low %v187_v0, %v187_v0  ;;  %v189_v2 = vcombine.high %v187_v0, %v187_v0  ;;  %s659_s7 = smov 126   ;;  %s660_s8 = smov 111   ;;  %342 = vmatprep.mubr.f32.mxu0 %v663_v5  ;;  %554 = vset.pattern.permute.xlu1 %v664_v6  ;;  %v264_v7 = vld [vmem:[%s871_s2] sm:$0xff]  ;;  %vm196_vm0 = vcmask 1039360   ;;  %vm212_vm1 = vcmask 916480  }
  0x39   : > { %s661_s10 = smov 110   ;;  %s662_s11 = smov 96   ;;  %555 = vset.pattern.permute.xlu0 %v664_v6  ;;  %vm254_vm2 = vcmask 1043456   ;;  %vm204_vm3 = vcmask 1031168   ;;  %vm220_vm4 = vcmask 908288   ;;  %vm228_vm5 = vcmask 900096  }
  0x3a   : > { %v519_v3 = vpack.i.bf16 %v187_v0, %v191_v1  ;;  %v524_v4 = vpack.i.bf16 %v189_v2, %v187_v0  ;;  %s665_s23 = smov 95   ;;  %s666_s17 = smov 94   ;;  %vm236_vm6 = vcmask 785408   ;;  %vm244_vm7 = vcmask 777216   ;;  %v263_v51 = vld [vmem:[%s870_s1] sm:$0xff] }
  0x3b   : > { %vm252_vm8 = vcmask 769024   ;;  %vm270_vm9 = vcmask 293888   ;;  %s444_s27 = sshll.u32 %s793_s29, 4  ;;  %s454_s28 = sshll.u32 %s709_s16, 8 }
  0x3c   : > { %520 = vrot.lane.b32.xlu0 %v519_v3, %s657_s4  ;;  %530 = vrot.lane.b32.xlu1 %v519_v3, %s658_s6  ;;  %s186_s30 = scalar_lea.vmem [#allocation5], %s444_s27  ;;  %s824_s6 = scalar_lea.hbm %s872_s3, %s454_s28 }
  0x3d   : > { %s366_s5 = sshll.u32 %s186_s30, 4  ;;  %s352_s16 = scalar_lea.sflag [#allocation4], %s793_s29  ;;  %s826_s5 = int_to_ptr.vmem [resolvable:$true] %s366_s5 }
  0x3e   : > { %p881_p11 = scmp.ne.s32.totalorder %s876_s24, 0 }
  0x40   : > { %525 = vrot.lane.b32.xlu0 %v524_v4, %s659_s7  ;;  %535 = vrot.lane.b32.xlu1 %v524_v4, %s660_s8  ;;  %s588_s7 = scalar_lea.vmem %s826_s5, 256  ;;  %s667_s8 = smov [#allocation5]  }
  0x41   : > { %p589_p6 = scmp.ne.s32.totalorder %s826_s5, %s588_s7 }
  0x43   : > { %p590_p12 = pnand %p589_p6, %p881_p11 }
  0x44   : > { %540 = vrot.lane.b32.xlu0 %v519_v3, %s661_s10  ;;  %545 = vrot.lane.b32.xlu1 %v524_v4, %s662_s11  ;;  %s592_s10 = sshll.u32 %s667_s8, 4  ;;  %s593_s10 = int_to_ptr.vmem [resolvable:$false] %s592_s10 }
  0x45   : > { %p591_p13 = pneg %p590_p12  ;;  %s594_s11 = scalar_lea.vmem %s593_s10, 512 }
  0x46   : > { %p595_p7 = scmp.lt.s32.totalorder %s826_s5, %s593_s10  ;;  %p596_p10 = scmp.lt.s32.totalorder %s594_s11, %s588_s7 }
  0x48   : > { %550 = vrot.lane.b32.xlu0 %v519_v3, %s665_s23  ;;  %248 = vrot.lane.b32.xlu1 %v187_v0, %s666_s17  ;;  %p597_p2 = por %p596_p10, %p595_p7 }
  0x4a   : > { %p598_p4 = pnand %p597_p2, %p591_p13 }
  0x4c   : > { %250 = vrot.lane.b32.xlu0 %v189_v2, %s666_s17  ;;  %267 = vperm.xlu1 %554, %v264_v7  }
  0xae   : > { %v521_v8 = vpop.permute.xlu0 %520  ;;  %v531_v9 = vpop.permute.xlu1 %530 }
  0xaf   : > { %v523_v10 = vunpack.i.h.bf16 %v521_v8  ;;  %v522_v11 = vunpack.i.l.bf16 %v521_v8  ;;  %v533_v12 = vunpack.i.h.bf16 %v531_v9  ;;  %v532_v13 = vunpack.i.l.bf16 %v531_v9 }
  0xb1   : > { %v197_v16 = vsel %vm196_vm0, %v522_v11, %v523_v10  ;;  %v213_v19 = vsel %vm212_vm1, %v532_v13, %v533_v12  ;;  %v256_v20 = vsel %vm254_vm2, %v189_v2, %v523_v10 }
  0xb2   : > { %v526_v14 = vpop.permute.xlu0 %525  ;;  %v536_v15 = vpop.permute.xlu1 %535  ;;  %v255_v23 = vsel %vm254_vm2, %v187_v0, %v197_v16 }
  0xb3   : > { %v528_v17 = vunpack.i.h.bf16 %v526_v14  ;;  %v527_v18 = vunpack.i.l.bf16 %v526_v14  ;;  %v538_v24 = vunpack.i.h.bf16 %v536_v15  ;;  %v537_v25 = vunpack.i.l.bf16 %v536_v15 }
  0xb5   : > { %v258_v21 = vsel %vm254_vm2, %v528_v17, %v533_v12  ;;  %v205_v22 = vsel %vm204_vm3, %v527_v18, %v528_v17  ;;  %v221_v35 = vsel %vm220_vm4, %v537_v25, %v538_v24 }
  0xb6   : > { %v541_v26 = vpop.permute.xlu0 %540  ;;  %v455_v27 = vpack.c.bf16 %v258_v21, %v256_v20  ;;  %v257_v28 = vsel %vm254_vm2, %v205_v22, %v213_v19  ;;  %v546_v29 = vpop.permute.xlu1 %545 }
  0xb7   : > { %v543_v30 = vunpack.i.h.bf16 %v541_v26  ;;  %v542_v31 = vunpack.i.l.bf16 %v541_v26  ;;  %v457_v32 = vpack.c.bf16 %v257_v28, %v255_v23  ;;  %v548_v33 = vunpack.i.h.bf16 %v546_v29 }
  0xb8   : > { %456 = vmatprep.subr.bf16.mxu0 %v455_v27  ;;  %v547_v34 = vunpack.i.l.bf16 %v546_v29 }
  0xb9   : > { %458 = vmatpush1.bf16.msra.mxu0 %v457_v32  ;;  %v229_v37 = vsel %vm228_vm5, %v542_v31, %v543_v30  ;;  %v260_v42 = vsel %vm254_vm2, %v538_v24, %v543_v30 }
  0xba   : > { %v551_v36 = vpop.permute.xlu0 %550  ;;  %v237_v38 = vsel %vm236_vm6, %v547_v34, %v548_v33  ;;  %v259_v45 = vsel %vm254_vm2, %v221_v35, %v229_v37  ;;  %v249_v48 = vpop.permute.xlu1 %248 }
  0xbb   : > { %v553_v39 = vunpack.i.h.bf16 %v551_v36  ;;  %v552_v40 = vunpack.i.l.bf16 %v551_v36 }
  0xbd   : > { %v245_v41 = vsel %vm244_vm7, %v552_v40, %v553_v39  ;;  %v262_v43 = vsel %vm254_vm2, %v548_v33, %v553_v39 }
  0xbe   : > { %v459_v44 = vpack.c.bf16 %v262_v43, %v260_v42  ;;  %v261_v46 = vsel %vm254_vm2, %v237_v38, %v245_v41  ;;  %v251_v49 = vpop.permute.xlu0 %250 }
  0xbf   : > { %v461_v47 = vpack.c.bf16 %v261_v46, %v259_v45  ;;  %v253_v50 = vsel %vm252_vm8, %v249_v48, %v251_v49 }
  0xc0   : > { %460 = vmatprep.subr.bf16.mxu0 %v459_v44 }
  0xc1   : > { %462 = vmatpush1.bf16.msra.mxu0 %v461_v47 }
  0xc2   : > { %445 = vmatprep.subr.msk.mxu0 %vm254_vm2, %v251_v49 }
  0xc5   : > { %446 = vmatpush1.msk.msra.mxu0 %vm254_vm2, %v253_v50 }
  0xc6   : > { %447 = vmatmul.mubr.msk.f32.vlgmr.msra.gmra.mrb[0].mxu0 %vm270_vm9, %v263_v51 }
  0xcb   : > { %v268_v52 = vpop.permute.xlu1 %267 }
 0x199   : > { %v344_v53 = vpop.f32.mrb[0].mxu0 }
 0x19a   : > { %v345_v54 = vadd.f32 %v344_v53, %v268_v52  ;;  %v346_v55 = vpop.f32.mrb[1].mxu0 }
 0x19b   : > { %v347_v56 = vadd.f32 %v346_v55, %v268_v52 }
 0x19c   : > { %349 = vst [vmem:[%s186_s30] sm:$0xff] %v345_v54 }
 0x19d   : > { %350 = vst.msk [vmem:[%s186_s30 + $0x8] sm:$0xff] %vm252_vm8, %v347_v56 }
 0x19e   : > { %601 = shalt.err (!%p598_p4)
}
 0x19f   : > { %s602_s29 = scalar_lea.hbm %s824_s6, 256  ;;  %s606_s19 = scalar_lea.hbm %s872_s3, 512 }
 0x1a0   : > { %p603_p5 = scmp.ne.s32.totalorder %s824_s6, %s602_s29  ;;  %p607_p0 = scmp.lt.u32.totalorder %s824_s6, %s872_s3 }
 0x1a1   : > { %p608_p1 = scmp.lt.u32.totalorder %s606_s19, %s602_s29  ;;  %p610_p6 = scmp.lt.u32.totalorder %s602_s29, %s824_s6 }
 0x1a2   : > { %p604_p8 = pnand %p603_p5, %p881_p11 }
 0x1a3   : > { %p609_p3 = por %p608_p1, %p607_p0 }
 0x1a4   : > { %p605_p9 = pneg %p604_p8 }
 0x1a5   : > { %p611_p12 = por %p610_p6, %p609_p3 }
 0x1a7   : > { %p612_p13 = pnand %p611_p12, %p605_p9 }
 0x1a9   : > { %615 = shalt.err (!%p612_p13)
}
 0x1aa   : > { %465 = dma.vmem_to_hbm [thread:$0]  (%p881_p11), %s826_s5, 256, %s824_s6, %s352_s16  }
 0x1ab PF: > { %s378_s26 = sand.u32 1, %s642_s12   ;;  %p882_p7 = scmp.ne.s32.totalorder %s877_s25, 0 }
 0x1ac   : > { %p883_p10 = scmp.ge.s32.totalorder %s654_s15, 2  ;;  %s379_s27 = scalar_lea.sflag [#allocation4], %s378_s26 }
 0x1ae   : > { %p472_p2 = pnand %p883_p10, %p882_p7 }
 0x1b0   : > { %637 = dma.done.wait (!%p472_p2), %s379_s27, 256  }
 0x1b1   : > { %639 = vsyncadd (!%p472_p2), %s379_s27, 4294967040  ;;  %p16_p4 = scmp.ge.s32.totalorder %s713_s18, 4   ;;  %s884_s12 = smov %s646_s13 }
 0x1b2   : > { %s885_s13 = smov %s650_s14  ;;  %s886_s14 = smov %s725_s21 }
 0x1b3   : > { %s887_s15 = smov %s713_s18  ;;  %18 = sbr.rel (!%p16_p4) target bundleno = 5 (0x5), region = 77 }
 0x1ba   :  { %384 = vsyncpa [#allocation3], 1 }
 0x1bb   :  { %386 = vsyncpa [#allocation3 + $0x1], 1 }
 0x1bc   :  { %387 = vsyncpa [#allocation4], 1 }
 0x1bd   :  { %389 = vsyncpa [#allocation4 + $0x1], 1 }

</bundles_post_ra>
